<compile_context>
chip_gen: v7x
topology: tpu7x:2x2x1
jax: 0.10.0
libtpu: 0.0.40
codegen_flags: <defaults>
</compile_context>

<pallas_src>
import functools

import jax
import jax.numpy as jnp
from jax import lax
from jax.experimental import pallas as pl
from jax.experimental.pallas import tpu as pltpu


def _round_up(n, m):
    return ((n + m - 1) // m) * m


def _largest_divisor_leq(n, cap):
    for d in range(min(n, cap), 0, -1):
        if n % d == 0:
            return d
    return 1


def _lstm_kernel(gx_ref, wh_ref, hseq_ref, hfin_ref, cfin_ref, h_sc, c_sc,
                 *, hidden_p, t_chunk):
    """One grid step = one (batch_tile, time_chunk).

    gx_ref  : (TC, TB, 4*Hp) fp32  precomputed x@Wx + (bx+bh) for this chunk
    wh_ref  : (Hp, 4*Hp)     bf16  resident recurrent weight
    hseq_ref: (TC, TB, Hp)   fp32  hidden states for this chunk (lane-dense)
    hfin/cfin: (1, TB, Hp)   fp32  final h / c, written only at the last chunk
    h_sc/c_sc: (TB, Hp)      fp32  carry across time chunks
    """
    tc = pl.program_id(1)

    # Zero initial state at the start of each batch tile's time loop
    # (matches the PyTorch forward when h, c are None).
    @pl.when(tc == 0)
    def _():
        h_sc[...] = jnp.zeros_like(h_sc)
        c_sc[...] = jnp.zeros_like(c_sc)

    wh = wh_ref[...]          # (Hp, 4Hp) bf16, loaded once per chunk
    Hp = hidden_p

    def step(s, carry):
        h_prev, c_prev = carry                       # fp32 values (vregs)
        # gates = gates_x[t] + h_{t-1} @ Wh   (bf16 matmul, fp32 accumulation)
        gates = gx_ref[s] + jnp.dot(
            h_prev.astype(jnp.bfloat16), wh, preferred_element_type=jnp.float32)
        f = jax.nn.sigmoid(gates[:, 0 * Hp:1 * Hp])  # forget
        i = jax.nn.sigmoid(gates[:, 1 * Hp:2 * Hp])  # input
        o = jax.nn.sigmoid(gates[:, 2 * Hp:3 * Hp])  # output
        g = jnp.tanh(gates[:, 3 * Hp:4 * Hp])        # cell candidate
        c_new = f * c_prev + i * g
        h_new = o * jnp.tanh(c_new)
        hseq_ref[s] = h_new.astype(hseq_ref.dtype)
        return h_new, c_new

    h_last, c_last = lax.fori_loop(
        0, t_chunk, step, (h_sc[...], c_sc[...]), unroll=True)

    h_sc[...] = h_last
    c_sc[...] = c_last

    @pl.when(tc == pl.num_programs(1) - 1)
    def _():
        hfin_ref[0] = h_last.astype(hfin_ref.dtype)
        cfin_ref[0] = c_last.astype(cfin_ref.dtype)


def lstm_forward(x, wx, wh, b, *, time_chunk=None):
    """x: (T, B, I); wx: (I, 4H); wh: (H, 4H); b: (1, 4H)  (b = bx + bh, folded).
    Returns (h_seq, (h_final, c_final)) like the PyTorch module."""
    T, B, I = x.shape
    H = wh.shape[0]
    assert wx.shape == (I, 4 * H) and wh.shape == (H, 4 * H) and b.shape == (1, 4 * H)

    f32, bf16 = jnp.float32, jnp.bfloat16

    # Lane/sublane-friendly padded sizes.
    Hp = _round_up(max(H, 128), 128)     # lane-aligned gate slices & stores
    Bp = _round_up(max(B, 8), 8)         # full fp32 sublanes
    if Bp > 128:
        TB = 128
        Bp = _round_up(Bp, TB)           # multiple batch tiles -> megacore parallel
    else:
        TB = Bp
    if time_chunk is None:
        time_chunk = _largest_divisor_leq(T, 16)
    TC = time_chunk
    assert T % TC == 0 and Bp % TB == 0

    # ---- pad weights per-gate from H to Hp (zeros keep padded lanes inert) ----
    def pad_gate_cols(w):                # (R, 4H) -> (R, 4Hp)
        R = w.shape[0]
        return jnp.pad(w.astype(f32).reshape(R, 4, H),
                       ((0, 0), (0, 0), (0, Hp - H))).reshape(R, 4 * Hp)

    wx_p = pad_gate_cols(wx)                                         # (I, 4Hp)
    wh_p = jnp.pad(pad_gate_cols(wh), ((0, Hp - H), (0, 0)))         # (Hp, 4Hp)
    b_p = pad_gate_cols(b)                                           # (1, 4Hp)

    x_p = jnp.pad(x.astype(f32), ((0, 0), (0, Bp - B), (0, 0)))      # (T, Bp, I)

    # ---- hoisted input projection: one big MXU matmul, bias folded in ----
    gx = (
        jnp.dot(x_p.reshape(T * Bp, I).astype(bf16), wx_p.astype(bf16),
                preferred_element_type=f32)
        + b_p
    ).reshape(T, Bp, 4 * Hp)

    kernel = functools.partial(_lstm_kernel, hidden_p=Hp, t_chunk=TC)

    h_seq_p, h_fin_p, c_fin_p = pl.pallas_call(
        kernel,
        out_shape=(
            jax.ShapeDtypeStruct((T, Bp, Hp), f32),   # h_seq
            jax.ShapeDtypeStruct((1, Bp, Hp), f32),   # final h
            jax.ShapeDtypeStruct((1, Bp, Hp), f32),   # final c
        ),
        grid_spec=pltpu.PrefetchScalarGridSpec(
            num_scalar_prefetch=0,
            grid=(Bp // TB, T // TC),                 # (batch tiles, time chunks)
            in_specs=[
                pl.BlockSpec((TC, TB, 4 * Hp), lambda bt, t: (t, bt, 0)),  # gx chunk
                pl.BlockSpec((Hp, 4 * Hp), lambda bt, t: (0, 0)),          # Wh resident
            ],
            out_specs=[
                pl.BlockSpec((TC, TB, Hp), lambda bt, t: (t, bt, 0)),      # h_seq chunk
                pl.BlockSpec((1, TB, Hp), lambda bt, t: (0, bt, 0)),       # final h
                pl.BlockSpec((1, TB, Hp), lambda bt, t: (0, bt, 0)),       # final c
            ],
            scratch_shapes=[
                pltpu.VMEM((TB, Hp), jnp.float32),    # h carry across chunks
                pltpu.VMEM((TB, Hp), jnp.float32),    # c carry across chunks
            ],
        ),
        compiler_params=pltpu.CompilerParams(
            dimension_semantics=("parallel", "arbitrary"),
            vmem_limit_bytes=64 << 20,
        ),
    )(gx, wh_p.astype(bf16))

    out_dt = x.dtype
    h_seq = h_seq_p[:, :B, :H].astype(out_dt)
    h_fin = h_fin_p[:, :B, :H].astype(out_dt)
    c_fin = c_fin_p[:, :B, :H].astype(out_dt)
    return h_seq, (h_fin, c_fin)


def _init_params(key, input_size, hidden_size):
    """Deterministic init mirroring nn.Linear default U(-1/sqrt(fan_in), 1/sqrt(fan_in)).
    Packs the 8 Linear layers into Wx (I, 4H), Wh (H, 4H), b (1, 4H); gate order f,i,o,g."""
    ks = jax.random.split(key, 16)
    kx = 1.0 / jnp.sqrt(jnp.asarray(input_size, jnp.float32))
    kh = 1.0 / jnp.sqrt(jnp.asarray(hidden_size, jnp.float32))

    def u(k, shape, bound):
        return jax.random.uniform(k, shape, jnp.float32, -bound, bound)

    gates_x_w, gates_x_b, gates_h_w, gates_h_b = [], [], [], []
    for gi in range(4):  # f, i, o, g
        gates_x_w.append(u(ks[4 * gi + 0], (hidden_size, input_size), kx))
        gates_x_b.append(u(ks[4 * gi + 1], (hidden_size,), kx))
        gates_h_w.append(u(ks[4 * gi + 2], (hidden_size, hidden_size), kh))
        gates_h_b.append(u(ks[4 * gi + 3], (hidden_size,), kh))

    wx = jnp.concatenate([w.T for w in gates_x_w], axis=1)                  # (I, 4H)
    wh = jnp.concatenate([w.T for w in gates_h_w], axis=1)                  # (H, 4H)
    b = (jnp.concatenate(gates_x_b) + jnp.concatenate(gates_h_b))[None, :]  # (1, 4H)
    return wx, wh, b


def _reference(x, wx, wh, b):
    """Pure-JAX fp32 reference of the PyTorch forward."""
    T, B, I = x.shape
    H = wh.shape[0]

    def step(carry, xt):
        h, c = carry
        gates = xt @ wx + h @ wh + b[0]
        f = jax.nn.sigmoid(gates[:, 0 * H:1 * H])
        i = jax.nn.sigmoid(gates[:, 1 * H:2 * H])
        o = jax.nn.sigmoid(gates[:, 2 * H:3 * H])
        g = jnp.tanh(gates[:, 3 * H:4 * H])
        c_new = f * c + i * g
        h_new = o * jnp.tanh(c_new)
        return (h_new, c_new), h_new

    h0 = jnp.zeros((B, H), x.dtype)
    c0 = jnp.zeros((B, H), x.dtype)
    (hT, cT), h_seq = jax.lax.scan(step, (h0, c0), x)
    return h_seq, (hT[None], cT[None])


if __name__ == "__main__":
    seq_len, batch, input_size, hidden_size = 8, 2, 4, 32

    key = jax.random.PRNGKey(0)
    k_x, k_p = jax.random.split(key)
    x = jax.random.normal(k_x, (seq_len, batch, input_size), jnp.float32)
    wx, wh, b = _init_params(k_p, input_size, hidden_size)

    # time_chunk=4 -> two time chunks, exercising the cross-chunk h/c carry.
    h_seq, (h_fin, c_fin) = lstm_forward(x, wx, wh, b, time_chunk=4)
    jax.block_until_ready((h_seq, h_fin, c_fin))

    # Correctness check against a pure-JAX fp32 scan reference.  The kernel uses
    # bf16 matmul operands (fp32 accumulation), so compare with loose tolerance.
    h_seq_r, (h_fin_r, c_fin_r) = _reference(x, wx, wh, b)
    assert h_seq.shape == h_seq_r.shape and h_fin.shape == (1, batch, hidden_size)
    assert jnp.allclose(h_seq, h_seq_r, atol=2e-2, rtol=2e-2)
    assert jnp.allclose(h_fin, h_fin_r, atol=2e-2, rtol=2e-2)
    assert jnp.allclose(c_fin, c_fin_r, atol=2e-2, rtol=2e-2)

    print("KERNEL_OK")
</pallas_src>

<mosaic_0001>
module attributes {stable_mosaic.version = 11 : i64} {
  func.func @_lstm_kernel(%arg0: i32, %arg1: i32, %arg2: memref<4x8x512xf32, #tpu.memory_space<vmem>>, %arg3: memref<128x512xbf16, #tpu.memory_space<vmem>>, %arg4: memref<4x8x128xf32, #tpu.memory_space<vmem>>, %arg5: memref<1x8x128xf32, #tpu.memory_space<vmem>>, %arg6: memref<1x8x128xf32, #tpu.memory_space<vmem>>, %arg7: memref<8x128xf32, #tpu.memory_space<vmem>>, %arg8: memref<8x128xf32, #tpu.memory_space<vmem>>) attributes {dimension_semantics = [#tpu.dimension_semantics<parallel>, #tpu.dimension_semantics<arbitrary>], iteration_bounds = array<i64: 1, 2>, scalar_prefetch = 0 : i64, scratch_operands = 2 : i64, tpu.core_type = #tpu.core_type<tc>, window_params = [{transform_indices = @transform_0, window_bounds = array<i64: 4, 8, 512>}, {pipeline_mode = #tpu.pipeline_mode<synchronous>, transform_indices = @transform_1, window_bounds = array<i64: 128, 512>}, {transform_indices = @transform_2, window_bounds = array<i64: 4, 8, 128>}, {transform_indices = @transform_3, window_bounds = array<i64: 1, 8, 128>}, {transform_indices = @transform_4, window_bounds = array<i64: 1, 8, 128>}]} {
    %c0_i32 = arith.constant 0 : i32
    %0 = arith.cmpi eq, %arg1, %c0_i32 : i32
    %1 = arith.extui %0 : i1 to i32
    %c0_i32_0 = arith.constant 0 : i32
    %2 = arith.cmpi ne, %1, %c0_i32_0 : i32
    scf.if %2 {
      %cst_44 = arith.constant 0.000000e+00 : f32
      %151 = vector.broadcast %cst_44 : f32 to vector<8x128xf32>
      %c0_45 = arith.constant 0 : index
      %c0_46 = arith.constant 0 : index
      %152 = vector.load %arg7[%c0_45, %c0_46] : memref<8x128xf32, #tpu.memory_space<vmem>>, vector<8x128xf32>
      tpu.vector_store %arg7[%c0_45, %c0_46], %151 {strides = array<i32>} : memref<8x128xf32, #tpu.memory_space<vmem>>, vector<8x128xf32>,
      %cst_47 = arith.constant 0.000000e+00 : f32
      %153 = vector.broadcast %cst_47 : f32 to vector<8x128xf32>
      %c0_48 = arith.constant 0 : index
      %c0_49 = arith.constant 0 : index
      %154 = vector.load %arg8[%c0_48, %c0_49] : memref<8x128xf32, #tpu.memory_space<vmem>>, vector<8x128xf32>
      tpu.vector_store %arg8[%c0_48, %c0_49], %153 {strides = array<i32>} : memref<8x128xf32, #tpu.memory_space<vmem>>, vector<8x128xf32>,
    } else {
    }
    %c0 = arith.constant 0 : index
    %c0_1 = arith.constant 0 : index
    %3 = vector.load %arg3[%c0, %c0_1] : memref<128x512xbf16, #tpu.memory_space<vmem>>, vector<128x512xbf16>
    %c0_2 = arith.constant 0 : index
    %c0_3 = arith.constant 0 : index
    %4 = vector.load %arg7[%c0_2, %c0_3] : memref<8x128xf32, #tpu.memory_space<vmem>>, vector<8x128xf32>
    %c0_4 = arith.constant 0 : index
    %c0_5 = arith.constant 0 : index
    %5 = vector.load %arg8[%c0_4, %c0_5] : memref<8x128xf32, #tpu.memory_space<vmem>>, vector<8x128xf32>
    %c0_i32_6 = arith.constant 0 : i32
    %6 = arith.index_cast %c0_i32_6 : i32 to index
    %c0_7 = arith.constant 0 : index
    %c0_8 = arith.constant 0 : index
    %7 = vector.load %arg2[%6, %c0_7, %c0_8] : memref<4x8x512xf32, #tpu.memory_space<vmem>>, vector<1x8x512xf32>
    %8 = vector.shape_cast %7 : vector<1x8x512xf32> to vector<8x512xf32>
    %9 = arith.truncf %4 : vector<8x128xf32> to vector<8x128xbf16>
    %cst = arith.constant dense<0.000000e+00> : vector<8x512xf32>
    %10 = tpu.matmul %9, %3, %cst {dimension_numbers = #tpu.dot_dimension_numbers<[1], [0], [0], [1], [0, 0, 1, 1], [], []>} : vector<8x128xbf16>, vector<128x512xbf16>, vector<8x512xf32> -> vector<8x512xf32>
    %11 = arith.addf %8, %10 : vector<8x512xf32>
    %12 = vector.extract_strided_slice %11 {offsets = [0, 0], sizes = [8, 128], strides = [1, 1]} : vector<8x512xf32> to vector<8x128xf32>
    %13 = arith.negf %12 : vector<8x128xf32>
    %14 = math.exp %13 : vector<8x128xf32>
    %cst_9 = arith.constant 1.000000e+00 : f32
    %15 = vector.broadcast %cst_9 : f32 to vector<8x128xf32>
    %16 = arith.addf %15, %14 : vector<8x128xf32>
    %17 = arith.divf %15, %16 : vector<8x128xf32>
    %18 = vector.extract_strided_slice %11 {offsets = [0, 128], sizes = [8, 128], strides = [1, 1]} : vector<8x512xf32> to vector<8x128xf32>
    %19 = arith.negf %18 : vector<8x128xf32>
    %20 = math.exp %19 : vector<8x128xf32>
    %cst_10 = arith.constant 1.000000e+00 : f32
    %21 = vector.broadcast %cst_10 : f32 to vector<8x128xf32>
    %22 = arith.addf %21, %20 : vector<8x128xf32>
    %23 = arith.divf %21, %22 : vector<8x128xf32>
    %24 = vector.extract_strided_slice %11 {offsets = [0, 256], sizes = [8, 128], strides = [1, 1]} : vector<8x512xf32> to vector<8x128xf32>
    %25 = arith.negf %24 : vector<8x128xf32>
    %26 = math.exp %25 : vector<8x128xf32>
    %cst_11 = arith.constant 1.000000e+00 : f32
    %27 = vector.broadcast %cst_11 : f32 to vector<8x128xf32>
    %28 = arith.addf %27, %26 : vector<8x128xf32>
    %29 = arith.divf %27, %28 : vector<8x128xf32>
    %30 = vector.extract_strided_slice %11 {offsets = [0, 384], sizes = [8, 128], strides = [1, 1]} : vector<8x512xf32> to vector<8x128xf32>
    %31 = math.tanh %30 : vector<8x128xf32>
    %32 = arith.mulf %17, %5 : vector<8x128xf32>
    %33 = arith.mulf %23, %31 : vector<8x128xf32>
    %34 = arith.addf %32, %33 : vector<8x128xf32>
    %35 = math.tanh %34 : vector<8x128xf32>
    %36 = arith.mulf %29, %35 : vector<8x128xf32>
    %37 = arith.index_cast %c0_i32_6 : i32 to index
    %c0_12 = arith.constant 0 : index
    %c0_13 = arith.constant 0 : index
    %38 = vector.load %arg4[%37, %c0_12, %c0_13] : memref<4x8x128xf32, #tpu.memory_space<vmem>>, vector<1x8x128xf32>
    %39 = vector.shape_cast %38 : vector<1x8x128xf32> to vector<8x128xf32>
    %40 = vector.shape_cast %36 : vector<8x128xf32> to vector<1x8x128xf32>
    tpu.vector_store %arg4[%37, %c0_12, %c0_13], %40 {strides = array<i32>} : memref<4x8x128xf32, #tpu.memory_space<vmem>>, vector<1x8x128xf32>,
    %c1_i32 = arith.constant 1 : i32
    %41 = arith.index_cast %c1_i32 : i32 to index
    %c0_14 = arith.constant 0 : index
    %c0_15 = arith.constant 0 : index
    %42 = vector.load %arg2[%41, %c0_14, %c0_15] : memref<4x8x512xf32, #tpu.memory_space<vmem>>, vector<1x8x512xf32>
    %43 = vector.shape_cast %42 : vector<1x8x512xf32> to vector<8x512xf32>
    %44 = arith.truncf %36 : vector<8x128xf32> to vector<8x128xbf16>
    %cst_16 = arith.constant dense<0.000000e+00> : vector<8x512xf32>
    %45 = tpu.matmul %44, %3, %cst_16 {dimension_numbers = #tpu.dot_dimension_numbers<[1], [0], [0], [1], [0, 0, 1, 1], [], []>} : vector<8x128xbf16>, vector<128x512xbf16>, vector<8x512xf32> -> vector<8x512xf32>
    %46 = arith.addf %43, %45 : vector<8x512xf32>
    %47 = vector.extract_strided_slice %46 {offsets = [0, 0], sizes = [8, 128], strides = [1, 1]} : vector<8x512xf32> to vector<8x128xf32>
    %48 = arith.negf %47 : vector<8x128xf32>
    %49 = math.exp %48 : vector<8x128xf32>
    %cst_17 = arith.constant 1.000000e+00 : f32
    %50 = vector.broadcast %cst_17 : f32 to vector<8x128xf32>
    %51 = arith.addf %50, %49 : vector<8x128xf32>
    %52 = arith.divf %50, %51 : vector<8x128xf32>
    %53 = vector.extract_strided_slice %46 {offsets = [0, 128], sizes = [8, 128], strides = [1, 1]} : vector<8x512xf32> to vector<8x128xf32>
    %54 = arith.negf %53 : vector<8x128xf32>
    %55 = math.exp %54 : vector<8x128xf32>
    %cst_18 = arith.constant 1.000000e+00 : f32
    %56 = vector.broadcast %cst_18 : f32 to vector<8x128xf32>
    %57 = arith.addf %56, %55 : vector<8x128xf32>
    %58 = arith.divf %56, %57 : vector<8x128xf32>
    %59 = vector.extract_strided_slice %46 {offsets = [0, 256], sizes = [8, 128], strides = [1, 1]} : vector<8x512xf32> to vector<8x128xf32>
    %60 = arith.negf %59 : vector<8x128xf32>
    %61 = math.exp %60 : vector<8x128xf32>
    %cst_19 = arith.constant 1.000000e+00 : f32
    %62 = vector.broadcast %cst_19 : f32 to vector<8x128xf32>
    %63 = arith.addf %62, %61 : vector<8x128xf32>
    %64 = arith.divf %62, %63 : vector<8x128xf32>
    %65 = vector.extract_strided_slice %46 {offsets = [0, 384], sizes = [8, 128], strides = [1, 1]} : vector<8x512xf32> to vector<8x128xf32>
    %66 = math.tanh %65 : vector<8x128xf32>
    %67 = arith.mulf %52, %34 : vector<8x128xf32>
    %68 = arith.mulf %58, %66 : vector<8x128xf32>
    %69 = arith.addf %67, %68 : vector<8x128xf32>
    %70 = math.tanh %69 : vector<8x128xf32>
    %71 = arith.mulf %64, %70 : vector<8x128xf32>
    %72 = arith.index_cast %c1_i32 : i32 to index
    %c0_20 = arith.constant 0 : index
    %c0_21 = arith.constant 0 : index
    %73 = vector.load %arg4[%72, %c0_20, %c0_21] : memref<4x8x128xf32, #tpu.memory_space<vmem>>, vector<1x8x128xf32>
    %74 = vector.shape_cast %73 : vector<1x8x128xf32> to vector<8x128xf32>
    %75 = vector.shape_cast %71 : vector<8x128xf32> to vector<1x8x128xf32>
    tpu.vector_store %arg4[%72, %c0_20, %c0_21], %75 {strides = array<i32>} : memref<4x8x128xf32, #tpu.memory_space<vmem>>, vector<1x8x128xf32>,
    %c2_i32 = arith.constant 2 : i32
    %76 = arith.index_cast %c2_i32 : i32 to index
    %c0_22 = arith.constant 0 : index
    %c0_23 = arith.constant 0 : index
    %77 = vector.load %arg2[%76, %c0_22, %c0_23] : memref<4x8x512xf32, #tpu.memory_space<vmem>>, vector<1x8x512xf32>
    %78 = vector.shape_cast %77 : vector<1x8x512xf32> to vector<8x512xf32>
    %79 = arith.truncf %71 : vector<8x128xf32> to vector<8x128xbf16>
    %cst_24 = arith.constant dense<0.000000e+00> : vector<8x512xf32>
    %80 = tpu.matmul %79, %3, %cst_24 {dimension_numbers = #tpu.dot_dimension_numbers<[1], [0], [0], [1], [0, 0, 1, 1], [], []>} : vector<8x128xbf16>, vector<128x512xbf16>, vector<8x512xf32> -> vector<8x512xf32>
    %81 = arith.addf %78, %80 : vector<8x512xf32>
    %82 = vector.extract_strided_slice %81 {offsets = [0, 0], sizes = [8, 128], strides = [1, 1]} : vector<8x512xf32> to vector<8x128xf32>
    %83 = arith.negf %82 : vector<8x128xf32>
    %84 = math.exp %83 : vector<8x128xf32>
    %cst_25 = arith.constant 1.000000e+00 : f32
    %85 = vector.broadcast %cst_25 : f32 to vector<8x128xf32>
    %86 = arith.addf %85, %84 : vector<8x128xf32>
    %87 = arith.divf %85, %86 : vector<8x128xf32>
    %88 = vector.extract_strided_slice %81 {offsets = [0, 128], sizes = [8, 128], strides = [1, 1]} : vector<8x512xf32> to vector<8x128xf32>
    %89 = arith.negf %88 : vector<8x128xf32>
    %90 = math.exp %89 : vector<8x128xf32>
    %cst_26 = arith.constant 1.000000e+00 : f32
    %91 = vector.broadcast %cst_26 : f32 to vector<8x128xf32>
    %92 = arith.addf %91, %90 : vector<8x128xf32>
    %93 = arith.divf %91, %92 : vector<8x128xf32>
    %94 = vector.extract_strided_slice %81 {offsets = [0, 256], sizes = [8, 128], strides = [1, 1]} : vector<8x512xf32> to vector<8x128xf32>
    %95 = arith.negf %94 : vector<8x128xf32>
    %96 = math.exp %95 : vector<8x128xf32>
    %cst_27 = arith.constant 1.000000e+00 : f32
    %97 = vector.broadcast %cst_27 : f32 to vector<8x128xf32>
    %98 = arith.addf %97, %96 : vector<8x128xf32>
    %99 = arith.divf %97, %98 : vector<8x128xf32>
    %100 = vector.extract_strided_slice %81 {offsets = [0, 384], sizes = [8, 128], strides = [1, 1]} : vector<8x512xf32> to vector<8x128xf32>
    %101 = math.tanh %100 : vector<8x128xf32>
    %102 = arith.mulf %87, %69 : vector<8x128xf32>
    %103 = arith.mulf %93, %101 : vector<8x128xf32>
    %104 = arith.addf %102, %103 : vector<8x128xf32>
    %105 = math.tanh %104 : vector<8x128xf32>
    %106 = arith.mulf %99, %105 : vector<8x128xf32>
    %107 = arith.index_cast %c2_i32 : i32 to index
    %c0_28 = arith.constant 0 : index
    %c0_29 = arith.constant 0 : index
    %108 = vector.load %arg4[%107, %c0_28, %c0_29] : memref<4x8x128xf32, #tpu.memory_space<vmem>>, vector<1x8x128xf32>
    %109 = vector.shape_cast %108 : vector<1x8x128xf32> to vector<8x128xf32>
    %110 = vector.shape_cast %106 : vector<8x128xf32> to vector<1x8x128xf32>
    tpu.vector_store %arg4[%107, %c0_28, %c0_29], %110 {strides = array<i32>} : memref<4x8x128xf32, #tpu.memory_space<vmem>>, vector<1x8x128xf32>,
    %c3_i32 = arith.constant 3 : i32
    %111 = arith.index_cast %c3_i32 : i32 to index
    %c0_30 = arith.constant 0 : index
    %c0_31 = arith.constant 0 : index
    %112 = vector.load %arg2[%111, %c0_30, %c0_31] : memref<4x8x512xf32, #tpu.memory_space<vmem>>, vector<1x8x512xf32>
    %113 = vector.shape_cast %112 : vector<1x8x512xf32> to vector<8x512xf32>
    %114 = arith.truncf %106 : vector<8x128xf32> to vector<8x128xbf16>
    %cst_32 = arith.constant dense<0.000000e+00> : vector<8x512xf32>
    %115 = tpu.matmul %114, %3, %cst_32 {dimension_numbers = #tpu.dot_dimension_numbers<[1], [0], [0], [1], [0, 0, 1, 1], [], []>} : vector<8x128xbf16>, vector<128x512xbf16>, vector<8x512xf32> -> vector<8x512xf32>
    %116 = arith.addf %113, %115 : vector<8x512xf32>
    %117 = vector.extract_strided_slice %116 {offsets = [0, 0], sizes = [8, 128], strides = [1, 1]} : vector<8x512xf32> to vector<8x128xf32>
    %118 = arith.negf %117 : vector<8x128xf32>
    %119 = math.exp %118 : vector<8x128xf32>
    %cst_33 = arith.constant 1.000000e+00 : f32
    %120 = vector.broadcast %cst_33 : f32 to vector<8x128xf32>
    %121 = arith.addf %120, %119 : vector<8x128xf32>
    %122 = arith.divf %120, %121 : vector<8x128xf32>
    %123 = vector.extract_strided_slice %116 {offsets = [0, 128], sizes = [8, 128], strides = [1, 1]} : vector<8x512xf32> to vector<8x128xf32>
    %124 = arith.negf %123 : vector<8x128xf32>
    %125 = math.exp %124 : vector<8x128xf32>
    %cst_34 = arith.constant 1.000000e+00 : f32
    %126 = vector.broadcast %cst_34 : f32 to vector<8x128xf32>
    %127 = arith.addf %126, %125 : vector<8x128xf32>
    %128 = arith.divf %126, %127 : vector<8x128xf32>
    %129 = vector.extract_strided_slice %116 {offsets = [0, 256], sizes = [8, 128], strides = [1, 1]} : vector<8x512xf32> to vector<8x128xf32>
    %130 = arith.negf %129 : vector<8x128xf32>
    %131 = math.exp %130 : vector<8x128xf32>
    %cst_35 = arith.constant 1.000000e+00 : f32
    %132 = vector.broadcast %cst_35 : f32 to vector<8x128xf32>
    %133 = arith.addf %132, %131 : vector<8x128xf32>
    %134 = arith.divf %132, %133 : vector<8x128xf32>
    %135 = vector.extract_strided_slice %116 {offsets = [0, 384], sizes = [8, 128], strides = [1, 1]} : vector<8x512xf32> to vector<8x128xf32>
    %136 = math.tanh %135 : vector<8x128xf32>
    %137 = arith.mulf %122, %104 : vector<8x128xf32>
    %138 = arith.mulf %128, %136 : vector<8x128xf32>
    %139 = arith.addf %137, %138 : vector<8x128xf32>
    %140 = math.tanh %139 : vector<8x128xf32>
    %141 = arith.mulf %134, %140 : vector<8x128xf32>
    %142 = arith.index_cast %c3_i32 : i32 to index
    %c0_36 = arith.constant 0 : index
    %c0_37 = arith.constant 0 : index
    %143 = vector.load %arg4[%142, %c0_36, %c0_37] : memref<4x8x128xf32, #tpu.memory_space<vmem>>, vector<1x8x128xf32>
    %144 = vector.shape_cast %143 : vector<1x8x128xf32> to vector<8x128xf32>
    %145 = vector.shape_cast %141 : vector<8x128xf32> to vector<1x8x128xf32>
    tpu.vector_store %arg4[%142, %c0_36, %c0_37], %145 {strides = array<i32>} : memref<4x8x128xf32, #tpu.memory_space<vmem>>, vector<1x8x128xf32>,
    %c4_i32 = arith.constant 4 : i32
    %c0_38 = arith.constant 0 : index
    %c0_39 = arith.constant 0 : index
    %146 = vector.load %arg7[%c0_38, %c0_39] : memref<8x128xf32, #tpu.memory_space<vmem>>, vector<8x128xf32>
    tpu.vector_store %arg7[%c0_38, %c0_39], %141 {strides = array<i32>} : memref<8x128xf32, #tpu.memory_space<vmem>>, vector<8x128xf32>,
    %c0_40 = arith.constant 0 : index
    %c0_41 = arith.constant 0 : index
    %147 = vector.load %arg8[%c0_40, %c0_41] : memref<8x128xf32, #tpu.memory_space<vmem>>, vector<8x128xf32>
    tpu.vector_store %arg8[%c0_40, %c0_41], %139 {strides = array<i32>} : memref<8x128xf32, #tpu.memory_space<vmem>>, vector<8x128xf32>,
    %c1_i32_42 = arith.constant 1 : i32
    %148 = arith.cmpi eq, %arg1, %c1_i32_42 : i32
    %149 = arith.extui %148 : i1 to i32
    %c0_i32_43 = arith.constant 0 : i32
    %150 = arith.cmpi ne, %149, %c0_i32_43 : i32
    scf.if %150 {
      %c0_44 = arith.constant 0 : index
      %c0_45 = arith.constant 0 : index
      %c0_46 = arith.constant 0 : index
      %151 = vector.load %arg5[%c0_44, %c0_45, %c0_46] : memref<1x8x128xf32, #tpu.memory_space<vmem>>, vector<1x8x128xf32>
      %152 = vector.shape_cast %151 : vector<1x8x128xf32> to vector<8x128xf32>
      %153 = vector.shape_cast %141 : vector<8x128xf32> to vector<1x8x128xf32>
      tpu.vector_store %arg5[%c0_44, %c0_45, %c0_46], %153 {strides = array<i32>} : memref<1x8x128xf32, #tpu.memory_space<vmem>>, vector<1x8x128xf32>,
      %c0_47 = arith.constant 0 : index
      %c0_48 = arith.constant 0 : index
      %c0_49 = arith.constant 0 : index
      %154 = vector.load %arg6[%c0_47, %c0_48, %c0_49] : memref<1x8x128xf32, #tpu.memory_space<vmem>>, vector<1x8x128xf32>
      %155 = vector.shape_cast %154 : vector<1x8x128xf32> to vector<8x128xf32>
      %156 = vector.shape_cast %139 : vector<8x128xf32> to vector<1x8x128xf32>
      tpu.vector_store %arg6[%c0_47, %c0_48, %c0_49], %156 {strides = array<i32>} : memref<1x8x128xf32, #tpu.memory_space<vmem>>, vector<1x8x128xf32>,
    } else {
    }
    return
  }
  func.func @transform_0(%arg0: i32, %arg1: i32) -> (i32, i32, i32) {
    %c0_i32 = arith.constant 0 : i32
    %c0_i32_0 = arith.constant 0 : i32
    return %arg1, %arg0, %c0_i32 : i32, i32, i32
  }
  func.func @transform_1(%arg0: i32, %arg1: i32) -> (i32, i32) {
    %c0_i32 = arith.constant 0 : i32
    %c0_i32_0 = arith.constant 0 : i32
    %c0_i32_1 = arith.constant 0 : i32
    return %c0_i32, %c0_i32_0 : i32, i32
  }
  func.func @transform_2(%arg0: i32, %arg1: i32) -> (i32, i32, i32) {
    %c0_i32 = arith.constant 0 : i32
    %c0_i32_0 = arith.constant 0 : i32
    return %arg1, %arg0, %c0_i32 : i32, i32, i32
  }
  func.func @transform_3(%arg0: i32, %arg1: i32) -> (i32, i32, i32) {
    %c0_i32 = arith.constant 0 : i32
    %c0_i32_0 = arith.constant 0 : i32
    %c0_i32_1 = arith.constant 0 : i32
    return %c0_i32, %arg0, %c0_i32_0 : i32, i32, i32
  }
  func.func @transform_4(%arg0: i32, %arg1: i32) -> (i32, i32, i32) {
    %c0_i32 = arith.constant 0 : i32
    %c0_i32_0 = arith.constant 0 : i32
    %c0_i32_1 = arith.constant 0 : i32
    return %c0_i32, %arg0, %c0_i32_0 : i32, i32, i32
  }
}

</mosaic_0001>

<bundles_post_ra>
// kernel: tpu_custom_call.1
= control target key start
LH: loop header
LB: loop body
LE: loop exit
PB: predicated region body
PF: predicated region fallthrough
CT: control target
= control target key end

     0   :  { %10 = vsyncpa [#allocation5], 0  ;;  %s2127_s0 = inlined_call_operand.hbm [shape: f32[8,8,512], index: 0, kind: input, shape index: {}]   ;;  %s2128_s1 = inlined_call_operand.hbm [shape: bf16[128,512], index: 1, kind: input, shape index: {}]   ;;  %s2129_s2 = inlined_call_operand.hbm [shape: f32[8,8,128], index: 2, kind: output, shape index: {0}]   ;;  %s2130_s3 = inlined_call_operand.hbm [shape: f32[1,8,128], index: 3, kind: output, shape index: {1}]   ;;  %s2131_s4 = inlined_call_operand.hbm [shape: f32[1,8,128], index: 4, kind: output, shape index: {2}]  }
   0x1   :  { %12 = vsyncpa [#allocation5 + $0x1], 0 }
   0x2   :  { %13 = vsyncpa [#allocation8], 0 }
   0x3   :  { %14 = vsyncpa [#allocation6], 0 }
   0x4   :  { %16 = vsyncpa [#allocation6 + $0x1], 0 }
   0x5   :  { %17 = vsyncpa [#allocation11], 0  ;;  %s1632_s15 = smov 0   ;;  %s1634_s16 = smov 0  }
   0x6   :  { %s1636_s17 = smov 0   ;;  %s1638_s18 = smov 0  }
   0x7   :  { %s1640_s19 = smov 0   ;;  %s1642_s20 = smov 0  }
   0x8 LB: > { %s1099_s21 = sadd.s32 4294967295, %s1592_s20   ;;  %s1100_s22 = sadd.s32 4294967294, %s1592_s20   ;;  %s1592_s20 = sphi %s1642_s20, %s23_s20   ;;  %s1588_s19 = sphi %s1640_s19, %s2157_s19   ;;  %s1584_s18 = sphi %s1638_s18, %s2156_s18   ;;  %s1580_s17 = sphi %s1636_s17, %s2155_s17   ;;  %s1576_s16 = sphi %s1634_s16, %s2154_s16   ;;  %s1572_s15 = sphi %s1632_s15, %s2153_s15  }
   0x9   : > { %p57_p0 = scmp.ne.s32.totalorder %s1576_s16, %s1572_s15  ;;  %p1666_p1 = scmp.eq.s32.totalorder %s1099_s21, 0 }
   0xa   : > { %p1670_p2 = scmp.eq.s32.totalorder %s1099_s21, 1  ;;  %p110_p3 = scmp.eq.s32.totalorder %s1100_s22, 1 }
   0xb   : > { %s2137_s23 = scalar_select %p1666_p1, 1, 0 }
   0xc   : > { %s2138_s24 = scalar_select %p1670_p2, 1, 0 }
   0xd   : > { %p1676_p4 = por %p1666_p1, %p57_p0  ;;  %p1101_p5 = scmp.ge.s32.totalorder %s1592_s20, 1 }
   0xe   : > { %p1681_p6 = por %p110_p3, %p57_p0  ;;  %p169_p7 = scmp.lt.s32.totalorder %s1592_s20, 3 }
   0xf   : > { %s2139_s25 = scalar_select %p1676_p4, 1, 0 }
  0x10   : > { %s2140_s26 = scalar_select %p1681_p6, 1, 0 }
  0x11   : > { %p1686_p8 = pnand %p1101_p5, %p169_p7  ;;  %s1594_s28 = smov [#allocation7]  }
  0x12   : > { %s181_s29 = sshll.u32 %s1594_s28, 4  ;;  %s32_s5 = sadd.s32 1, %s1588_s19  ;;  %s182_s29 = int_to_ptr.vmem [resolvable:$true] %s181_s29 }
  0x13   : > { %s2141_s27 = scalar_select %p1686_p8, 1, 0 }
  0x14   : > { %p1201_p9 = pneg %p1686_p8  ;;  %s1392_s8 = scalar_lea.hbm %s2128_s1, 4096 }
  0x15   : > { %p1393_p12 = scmp.ne.s32.totalorder %s2128_s1, %s1392_s8  ;;  %p1399_p5 = scmp.lt.u32.totalorder %s1392_s8, %s2128_s1 }
  0x16   : > { %p1695_p11 = pnand %p1201_p9, %p1666_p1 }
  0x18   : > { %p1394_p13 = pneg %p1695_p11 }
  0x1a   : > { %p1395_p0 = pnand %p1394_p13, %p1393_p12 }
  0x1c   : > { %p1396_p3 = pneg %p1395_p0 }
  0x1e   : > { %p1401_p7 = pnand %p1399_p5, %p1396_p3 }
  0x20   : > { %1404 = shalt.err (!%p1401_p7)
}
  0x21   : > { %s1405_s13 = scalar_lea.vmem %s182_s29, 4096  ;;  %p1413_p1 = scmp.lt.s32.totalorder %s182_s29, %s182_s29 }
  0x22   : > { %p1406_p9 = scmp.ne.s32.totalorder %s182_s29, %s1405_s13  ;;  %p1414_p4 = scmp.lt.s32.totalorder %s1405_s13, %s1405_s13 }
  0x24   : > { %p1408_p10 = pnand %p1406_p9, %p1394_p13  ;;  %p1415_p8 = por %p1414_p4, %p1413_p1 }
  0x26   : > { %p1409_p6 = pneg %p1408_p10 }
  0x28   : > { %p1416_p2 = pnand %p1415_p8, %p1409_p6 }
  0x2a   : > { %1419 = shalt.err (!%p1416_p2)
}
  0x2b   : > { %s1595_s14 = smov 256   ;;  %s1596_s21 = smov 16  }
  0x2c   : > { %1204 = dma.hbm_to_vmem [thread:$0]  (!%p1695_p11), %s2128_s1, 4096, %s182_s29, [#allocation8], %s1595_s14, %s1595_s14, %s1596_s21  }
  0x2d   : > { %p33_p1 = scmp.ge.s32.totalorder %s32_s5, 2  ;;  %s44_s6 = sadd.s32 1, %s1580_s17 }
  0x2e   : > { %p51_p2 = scmp.ne.s32.totalorder %s1580_s17, %s1576_s16  ;;  %p52_p4 = scmp.eq.s32.totalorder %s1592_s20, 0 }
  0x2f   : > { %s2159_s5 = smov (%p33_p1, %s32_s5), 0  ;;  %p2144_p8 = scmp.ne.s32.totalorder %s2138_s24, 0 }
  0x30   : > { %p1722_p6 = por %p52_p4, %p51_p2  ;;  %s39_s30 = ssub.s32 %s1588_s19, %s2159_s5 }
  0x31   : > { %p1728_p10 = por %p2144_p8, %p51_p2  ;;  %p1214_p12 = scmp.lt.s32.totalorder %s1592_s20, 2 }
  0x32   : > { %p42_p11 = scmp.eq.s32.totalorder %s39_s30, 0  ;;  %s195_s29 = sand.u32 1, %s1580_s17  }
  0x33   : > { %s1104_s9 = sshll.u32 %s195_s29, 7  ;;  %s1183_s11 = sshll.u32 %s1588_s19, 11 }
  0x34   : > { %s1737_s10 = scalar_select %p42_p11, %s1580_s17, %s44_s6  }
  0x35   : > { %s1743_s14 = scalar_lea.hbm %s2127_s0, %s1183_s11  ;;  %s199_s21 = scalar_lea.vmem [#allocation4], %s1104_s9 }
  0x36   : > { %s209_s22 = sshll.u32 %s199_s21, 4  ;;  %p1749_p13 = pnand %p1214_p12, %p1722_p6  ;;  %s1745_s22 = int_to_ptr.vmem [resolvable:$true] %s209_s22 }
  0x37   : > { %s1753_s6 = scalar_lea.sflag [#allocation5], %s195_s29  ;;  %s1420_s30 = scalar_lea.hbm %s1743_s14, 2048 }
  0x38   : > { %p1421_p0 = scmp.ne.s32.totalorder %s1743_s14, %s1420_s30  ;;  %p1422_p3 = pneg %p1749_p13 }
  0x39   : > { %s1425_s7 = scalar_lea.hbm %s2127_s0, 4096  ;;  %p1426_p9 = scmp.lt.u32.totalorder %s1743_s14, %s2127_s0 }
  0x3a   : > { %p1423_p5 = pnand %p1422_p3, %p1421_p0  ;;  %p1427_p1 = scmp.lt.u32.totalorder %s1425_s7, %s1420_s30 }
  0x3b   : > { %p1429_p4 = scmp.lt.u32.totalorder %s1420_s30, %s1743_s14 }
  0x3c   : > { %p1424_p7 = pneg %p1423_p5  ;;  %p1428_p2 = por %p1427_p1, %p1426_p9 }
  0x3e   : > { %p1430_p6 = por %p1429_p4, %p1428_p2 }
  0x40   : > { %p1431_p8 = pnand %p1430_p6, %p1424_p7 }
  0x42   : > { %1434 = shalt.err (!%p1431_p8)
}
  0x43   : > { %s1435_s29 = scalar_lea.vmem %s1745_s22, 2048  ;;  %s1597_s21 = smov [#allocation4]  }
  0x44   : > { %p1436_p12 = scmp.ne.s32.totalorder %s1745_s22, %s1435_s29  ;;  %s1440_s9 = sshll.u32 %s1597_s21, 4  ;;  %s1441_s9 = int_to_ptr.vmem [resolvable:$false] %s1440_s9 }
  0x45   : > { %s1442_s11 = scalar_lea.vmem %s1441_s9, 4096  ;;  %p1443_p5 = scmp.lt.s32.totalorder %s1745_s22, %s1441_s9 }
  0x46   : > { %p1438_p11 = pnand %p1436_p12, %p1422_p3  ;;  %p1444_p9 = scmp.lt.s32.totalorder %s1442_s11, %s1435_s29 }
  0x48   : > { %p1439_p0 = pneg %p1438_p11  ;;  %p1445_p1 = por %p1444_p9, %p1443_p5 }
  0x4a   : > { %p1446_p2 = pnand %p1445_p1, %p1439_p0 }
  0x4c   : > { %1449 = shalt.err (!%p1446_p2)
}
  0x4d   : > { %s1598_s30 = smov 512   ;;  %s1599_s7 = smov 32  }
  0x4e   : > { %1208 = dma.hbm_to_vmem [thread:$0]  (!%p1749_p13), %s1743_s14, 2048, %s1745_s22, %s1753_s6, %s1598_s30, %s1598_s30, %s1599_s7  }
  0x4f   : > { %p2147_p3 = scmp.ne.s32.totalorder %s2141_s27, 0 }
  0x50   : > { %s1784_s12 = sand.u32 (!%p2147_p3), 1, %s1576_s16   ;;  %p2148_p7 = scmp.ne.s32.totalorder (!%p2147_p3), %s2139_s25, 0 }
  0x51   : > { %221 = sbr.rel (%p2147_p3) target bundleno = 1251 (0x4e3), region = 28  ;;  %s1109_s13 = sshll.u32 (!%p2147_p3), %s1784_s12, 7 }
  0x52   : > { %s224_s29 = scalar_lea.sflag (!%p2147_p3), [#allocation5], %s1784_s12  ;;  %s1788_s21 = scalar_lea.vmem (!%p2147_p3), [#allocation4], %s1109_s13 }
  0x58   : > { %1555 = dma.done.wait (%p2148_p7), %s224_s29, 2048  }
  0x59   : > { %1557 = vsyncadd (%p2148_p7), %s224_s29, 4294965248  ;;  %p2149_p13 = scmp.ne.s32.totalorder %s2137_s23, 0 }
  0x5b   : > { %1559 = dma.done.wait (%p2149_p13), [#allocation8], 4096  }
  0x5c   : > { %1561 = vsyncadd (%p2149_p13), [#allocation8], 4294963200  ;;  %s1111_s27 = sshll.u32 %s1784_s12, 5  ;;  %p1112_p4 = scmp.ne.s32.totalorder %s1584_s18, 0 }
  0x5d   : > { %s1799_s14 = scalar_lea.vmem [#allocation9], %s1111_s27  ;;  %v1600_v0 = vmov (!%p1112_p4), 0.0  }
  0x5e   : > { %262 = sbr.rel (%p1112_p4) target bundleno = 101 (0x65), region = 40  ;;  %263 = vst [vmem:[#allocation2] sm:$0xff] (!%p1112_p4), %v1600_v0  ;;  %264 = vst [vmem:[#allocation3] sm:$0xff] (!%p1112_p4), %v1600_v0 }
  0x65 PF: > { %v1802_v1 = vld [vmem:[#allocation7 + $0x4] ss:$16 sps:$4 sm:$0xff]   ;;  %v1804_v2 = vld [vmem:[#allocation7] ss:$16 sps:$4 sm:$0xff]   ;;  %v1601_v3 = vmov 0   ;;  %v300_v37 = vld [vmem:[%s1788_s21 + $0x8] sm:$0xff] }
  0x66   : > { %496 = vmatprep.mubr.bf16.mxu0 %v1601_v3  ;;  %537 = vmatprep.mubr.bf16.mxu1 %v1601_v3  ;;  %v1809_v4 = vld [vmem:[#allocation7 + $0x24] ss:$16 sps:$4 sm:$0xff]   ;;  %v1812_v5 = vld [vmem:[#allocation7 + $0x20] ss:$16 sps:$4 sm:$0xff]   ;;  %v1817_v7 = vld [vmem:[#allocation7 + $0xc] ss:$16 sps:$4 sm:$0xff]  }
  0x67   : > { %464 = vmatprep.subr.bf16.mxu0 %v1802_v1  ;;  %v1815_v6 = vld [vmem:[#allocation7 + $0x44] ss:$16 sps:$4 sm:$0xff]   ;;  %v1819_v8 = vld [vmem:[#allocation7 + $0x8] ss:$16 sps:$4 sm:$0xff]   ;;  %v1822_v9 = vld [vmem:[#allocation7 + $0x40] ss:$16 sps:$4 sm:$0xff]   ;;  %505 = vmatprep.subr.bf16.mxu1 %v1817_v7 }
  0x68   : > { %465 = vmatpush1.bf16.msra.mxu0 %v1804_v2  ;;  %v1826_v10 = vld [vmem:[#allocation7 + $0x64] ss:$16 sps:$4 sm:$0xff]   ;;  %506 = vmatpush1.bf16.msra.mxu1 %v1819_v8  ;;  %v1829_v11 = vld [vmem:[#allocation7 + $0x2c] ss:$16 sps:$4 sm:$0xff]   ;;  %v1831_v12 = vld [vmem:[#allocation7 + $0x28] ss:$16 sps:$4 sm:$0xff]  }
  0x69   : > { %466 = vmatprep.subr.bf16.mxu0 %v1809_v4  ;;  %507 = vmatprep.subr.bf16.mxu1 %v1829_v11  ;;  %v1835_v13 = vld [vmem:[#allocation7 + $0x60] ss:$16 sps:$4 sm:$0xff]   ;;  %v1837_v14 = vld [vmem:[#allocation7 + $0x84] ss:$16 sps:$4 sm:$0xff]   ;;  %v1839_v15 = vld [vmem:[#allocation7 + $0x4c] ss:$16 sps:$4 sm:$0xff]  }
  0x6a   : > { %v1843_v16 = vld [vmem:[#allocation7 + $0x48] ss:$16 sps:$4 sm:$0xff]   ;;  %v1846_v17 = vld [vmem:[#allocation7 + $0x6c] ss:$16 sps:$4 sm:$0xff]   ;;  %v1849_v18 = vld [vmem:[#allocation7 + $0x80] ss:$16 sps:$4 sm:$0xff]  }
  0x6b   : > { %v1852_v19 = vld [vmem:[#allocation7 + $0xa4] ss:$16 sps:$4 sm:$0xff]   ;;  %v1855_v20 = vld [vmem:[#allocation7 + $0x68] ss:$16 sps:$4 sm:$0xff]   ;;  %v1858_v21 = vld [vmem:[#allocation7 + $0x8c] ss:$16 sps:$4 sm:$0xff]  }
  0x6c   : > { %467 = vmatpush1.bf16.msra.mxu0 %v1812_v5  ;;  %508 = vmatpush1.bf16.msra.mxu1 %v1831_v12  ;;  %v1860_v22 = vld [vmem:[#allocation7 + $0xa0] ss:$16 sps:$4 sm:$0xff]   ;;  %v1863_v23 = vld [vmem:[#allocation7 + $0xc4] ss:$16 sps:$4 sm:$0xff]   ;;  %v1867_v24 = vld [vmem:[#allocation7 + $0x88] ss:$16 sps:$4 sm:$0xff]  }
  0x6d   : > { %468 = vmatprep.subr.bf16.mxu0 %v1815_v6  ;;  %509 = vmatprep.subr.bf16.mxu1 %v1839_v15  ;;  %v1870_v25 = vld [vmem:[#allocation7 + $0xac] ss:$16 sps:$4 sm:$0xff]   ;;  %v1873_v26 = vld [vmem:[#allocation7 + $0xc0] ss:$16 sps:$4 sm:$0xff]   ;;  %v1876_v27 = vld [vmem:[#allocation7 + $0xe4] ss:$16 sps:$4 sm:$0xff]  }
  0x6e   : > { %v1879_v28 = vld [vmem:[#allocation7 + $0xa8] ss:$16 sps:$4 sm:$0xff]   ;;  %v1882_v29 = vld [vmem:[#allocation7 + $0xcc] ss:$16 sps:$4 sm:$0xff]   ;;  %v1885_v30 = vld [vmem:[#allocation7 + $0xe0] ss:$16 sps:$4 sm:$0xff]  }
  0x6f   : > { %v297_v31 = vld [vmem:[#allocation2] sm:$0xff]  ;;  %v1889_v32 = vld [vmem:[#allocation7 + $0xc8] ss:$16 sps:$4 sm:$0xff]   ;;  %v1892_v33 = vld [vmem:[#allocation7 + $0xec] ss:$16 sps:$4 sm:$0xff]   ;;  %p1172_p6 = scmp.ne.s32.totalorder %s1584_s18, 1 }
  0x70   : > { %469 = vmatpush1.bf16.msra.mxu0 %v1822_v9  ;;  %510 = vmatpush1.bf16.msra.mxu1 %v1843_v16  ;;  %v303_v34 = vpack.c.bf16 %v297_v31, %v297_v31  ;;  %v1896_v35 = vld [vmem:[#allocation7 + $0xe8] ss:$16 sps:$4 sm:$0xff]   ;;  %v299_v36 = vld [vmem:[%s1788_s21] sm:$0xff]  ;;  %v301_v46 = vld [vmem:[%s1788_s21 + $0x10] sm:$0xff] }
  0x71   : > { %470 = vmatprep.subr.bf16.mxu0 %v1826_v10  ;;  %511 = vmatprep.subr.bf16.mxu1 %v1846_v17  ;;  %v302_v52 = vld [vmem:[%s1788_s21 + $0x18] sm:$0xff] }
  0x72   : > { %v298_v60 = vld [vmem:[#allocation3] sm:$0xff] }
  0x74   : > { %471 = vmatpush1.bf16.msra.mxu0 %v1835_v13  ;;  %512 = vmatpush1.bf16.msra.mxu1 %v1855_v20 }
  0x75   : > { %472 = vmatprep.subr.bf16.mxu0 %v1837_v14  ;;  %513 = vmatprep.subr.bf16.mxu1 %v1858_v21 }
  0x78   : > { %473 = vmatpush1.bf16.msra.mxu0 %v1849_v18  ;;  %514 = vmatpush1.bf16.msra.mxu1 %v1867_v24 }
  0x79   : > { %474 = vmatprep.subr.bf16.mxu0 %v1852_v19  ;;  %515 = vmatprep.subr.bf16.mxu1 %v1870_v25 }
  0x7c   : > { %475 = vmatpush1.bf16.msra.mxu0 %v1860_v22  ;;  %516 = vmatpush1.bf16.msra.mxu1 %v1879_v28 }
  0x7d   : > { %476 = vmatprep.subr.bf16.mxu0 %v1863_v23  ;;  %517 = vmatprep.subr.bf16.mxu1 %v1882_v29 }
  0x80   : > { %477 = vmatpush1.bf16.msra.mxu0 %v1873_v26  ;;  %518 = vmatpush1.bf16.msra.mxu1 %v1889_v32 }
  0x81   : > { %478 = vmatprep.subr.bf16.mxu0 %v1876_v27  ;;  %519 = vmatprep.subr.bf16.mxu1 %v1892_v33 }
  0x84   : > { %479 = vmatpush1.bf16.msra.mxu0 %v1885_v30  ;;  %520 = vmatpush1.bf16.msra.mxu1 %v1896_v35 }
  0x85   : > { %581 = vmatprep.subr.bf16.mxu0 %v1802_v1  ;;  %622 = vmatprep.subr.bf16.mxu1 %v1817_v7 }
  0x87   : > { %497 = vmatmul.mubr.bf16.vlgmr.msra.gmra.mrb[0].mxu0 %v303_v34  ;;  %538 = vmatmul.mubr.bf16.vlgmr.msra.gmra.mrb[0].mxu1 %v303_v34 }
  0x88   : > { %582 = vmatpush1.bf16.msra.mxu0 %v1804_v2  ;;  %613 = vmatprep.mubr.bf16.mxu0 %v1601_v3 }
  0x89   : > { %583 = vmatprep.subr.bf16.mxu0 %v1809_v4  ;;  %623 = vmatpush1.bf16.msra.mxu1 %v1819_v8 }
  0x8a   : > { %624 = vmatprep.subr.bf16.mxu1 %v1829_v11  ;;  %654 = vmatprep.mubr.bf16.mxu1 %v1601_v3 }
  0x8c   : > { %584 = vmatpush1.bf16.msra.mxu0 %v1812_v5 }
  0x8d   : > { %585 = vmatprep.subr.bf16.mxu0 %v1815_v6  ;;  %625 = vmatpush1.bf16.msra.mxu1 %v1831_v12 }
  0x8e   : > { %626 = vmatprep.subr.bf16.mxu1 %v1839_v15 }
  0x90   : > { %586 = vmatpush1.bf16.msra.mxu0 %v1822_v9 }
  0x91   : > { %587 = vmatprep.subr.bf16.mxu0 %v1826_v10  ;;  %627 = vmatpush1.bf16.msra.mxu1 %v1843_v16 }
  0x92   : > { %628 = vmatprep.subr.bf16.mxu1 %v1846_v17 }
  0x94   : > { %588 = vmatpush1.bf16.msra.mxu0 %v1835_v13 }
  0x95   : > { %589 = vmatprep.subr.bf16.mxu0 %v1837_v14  ;;  %629 = vmatpush1.bf16.msra.mxu1 %v1855_v20 }
  0x96   : > { %630 = vmatprep.subr.bf16.mxu1 %v1858_v21 }
  0x98   : > { %590 = vmatpush1.bf16.msra.mxu0 %v1849_v18 }
  0x99   : > { %591 = vmatprep.subr.bf16.mxu0 %v1852_v19  ;;  %631 = vmatpush1.bf16.msra.mxu1 %v1867_v24 }
  0x9a   : > { %632 = vmatprep.subr.bf16.mxu1 %v1870_v25 }
  0x9c   : > { %592 = vmatpush1.bf16.msra.mxu0 %v1860_v22 }
  0x9d   : > { %593 = vmatprep.subr.bf16.mxu0 %v1863_v23  ;;  %633 = vmatpush1.bf16.msra.mxu1 %v1879_v28 }
  0x9e   : > { %634 = vmatprep.subr.bf16.mxu1 %v1882_v29 }
  0xa0   : > { %594 = vmatpush1.bf16.msra.mxu0 %v1873_v26 }
  0xa1   : > { %595 = vmatprep.subr.bf16.mxu0 %v1876_v27  ;;  %635 = vmatpush1.bf16.msra.mxu1 %v1889_v32 }
  0xa2   : > { %636 = vmatprep.subr.bf16.mxu1 %v1892_v33 }
  0xa4   : > { %596 = vmatpush1.bf16.msra.mxu0 %v1885_v30 }
  0xa5   : > { %699 = vmatprep.subr.bf16.mxu0 %v1802_v1  ;;  %637 = vmatpush1.bf16.msra.mxu1 %v1896_v35 }
  0xa6   : > { %740 = vmatprep.subr.bf16.mxu1 %v1817_v7 }
 0x15a   : > { %v498_v38 = vpop.f32.mrb[0].mxu0  ;;  %v539_v47 = vpop.f32.mrb[0].mxu1 }
 0x15b   : > { %v546_v39 = vadd.f32 %v498_v38, %v299_v36  ;;  %v500_v40 = vpop.f32.mrb[1].mxu0  ;;  %v541_v48 = vpop.f32.mrb[1].mxu1  ;;  %v548_v49 = vadd.f32 %v539_v47, %v301_v46 }
 0x15c   : > { %v547_v41 = vadd.f32 %v500_v40, %v300_v37  ;;  %v502_v42 = vpop.f32.mrb[2].mxu0  ;;  %v543_v50 = vpop.f32.mrb[2].mxu1  ;;  %v549_v54 = vadd.f32 %v541_v48, %v302_v52 }
 0x15d   : > { %v1145_v43 = vmul.f32 -1.442695, %v546_v39  ;;  %v503_v44 = vpop.f32.mrb[3].mxu0  ;;  %v544_v51 = vpop.f32.mrb[3].mxu1  ;;  %v1147_v53 = vmul.f32 -1.442695, %v548_v49 }
 0x15e   : > { %v1146_v45 = vmul.f32 -1.442695, %v547_v41  ;;  %v1148_v41 = vld [vmem:[%s1788_s21 + $0x20] sm:$0xff]  ;;  %v1149_v42 = vld [vmem:[%s1788_s21 + $0x28] sm:$0xff] }
 0x15f   : > { %1328 = vpow2.f32 %v1145_v43 }
 0x160   : > { %1330 = vpow2.f32 %v1146_v45 }
 0x161   : > { %1332 = vpow2.f32 %v1147_v53 }
 0x162   : > { %1334 = vtanh.f32 %v549_v54 }
 0x169   : > { %v1329_v55 = vpop.eup %1328 }
 0x16a   : > { %v1331_v56 = vpop.eup %1330  ;;  %v553_v57 = vadd.f32 1.0, %v1329_v55  ;;  %v1151_v55 = vld [vmem:[%s1788_s21 + $0x38] sm:$0xff] }
 0x16b   : > { %v559_v58 = vadd.f32 1.0, %v1331_v56  ;;  %v1333_v59 = vpop.eup %1332 }
 0x16c   : > { %1336 = vrcp.f32 %v553_v57  ;;  %v1335_v61 = vpop.eup %1334  ;;  %v565_v63 = vadd.f32 1.0, %v1333_v59 }
 0x16d   : > { %1338 = vrcp.f32 %v559_v58 }
 0x16e   : > { %1340 = vrcp.f32 %v565_v63 }
 0x176   : > { %v1337_v62 = vpop.eup %1336 }
 0x177   : > { %v1339_v0 = vpop.eup %1338  ;;  %v569_v31 = vmul.f32 %v1337_v62, %v298_v60 }
 0x178   : > { %v570_v34 = vmul.f32 %v1339_v0, %v1335_v61  ;;  %v1341_v37 = vpop.eup %1340 }
 0x17a   : > { %v1940_v36 = vadd.f32 %v570_v34, %v569_v31 }
 0x17c   : > { %1342 = vtanh.f32 %v1940_v36 }
 0x186   : > { %v1343_v38 = vpop.eup %1342 }
 0x187   : > { %v573_v39 = vmul.f32 %v1343_v38, %v1341_v37 }
 0x189   : > { %574 = vst [vmem:[%s1799_s14] sm:$0xff] %v573_v39  ;;  %v580_v40 = vpack.c.bf16 %v573_v39, %v573_v39 }
 0x18b   : > { %614 = vmatmul.mubr.bf16.vlgmr.msra.gmra.mrb[4].mxu0 %v580_v40  ;;  %655 = vmatmul.mubr.bf16.vlgmr.msra.gmra.mrb[4].mxu1 %v580_v40 }
 0x18c   : > { %700 = vmatpush1.bf16.msra.mxu0 %v1804_v2  ;;  %741 = vmatpush1.bf16.msra.mxu1 %v1819_v8 }
 0x18d   : > { %701 = vmatprep.subr.bf16.mxu0 %v1809_v4  ;;  %742 = vmatprep.subr.bf16.mxu1 %v1829_v11 }
 0x18e   : > { %731 = vmatprep.mubr.bf16.mxu0 %v1601_v3  ;;  %772 = vmatprep.mubr.bf16.mxu1 %v1601_v3 }
 0x190   : > { %702 = vmatpush1.bf16.msra.mxu0 %v1812_v5  ;;  %743 = vmatpush1.bf16.msra.mxu1 %v1831_v12 }
 0x191   : > { %703 = vmatprep.subr.bf16.mxu0 %v1815_v6  ;;  %744 = vmatprep.subr.bf16.mxu1 %v1839_v15 }
 0x194   : > { %704 = vmatpush1.bf16.msra.mxu0 %v1822_v9  ;;  %745 = vmatpush1.bf16.msra.mxu1 %v1843_v16 }
 0x195   : > { %705 = vmatprep.subr.bf16.mxu0 %v1826_v10  ;;  %746 = vmatprep.subr.bf16.mxu1 %v1846_v17 }
 0x198   : > { %706 = vmatpush1.bf16.msra.mxu0 %v1835_v13  ;;  %747 = vmatpush1.bf16.msra.mxu1 %v1855_v20 }
 0x199   : > { %707 = vmatprep.subr.bf16.mxu0 %v1837_v14  ;;  %748 = vmatprep.subr.bf16.mxu1 %v1858_v21 }
 0x19c   : > { %708 = vmatpush1.bf16.msra.mxu0 %v1849_v18  ;;  %749 = vmatpush1.bf16.msra.mxu1 %v1867_v24 }
 0x19d   : > { %709 = vmatprep.subr.bf16.mxu0 %v1852_v19  ;;  %750 = vmatprep.subr.bf16.mxu1 %v1870_v25 }
 0x1a0   : > { %710 = vmatpush1.bf16.msra.mxu0 %v1860_v22  ;;  %751 = vmatpush1.bf16.msra.mxu1 %v1879_v28 }
 0x1a1   : > { %711 = vmatprep.subr.bf16.mxu0 %v1863_v23  ;;  %752 = vmatprep.subr.bf16.mxu1 %v1882_v29 }
 0x1a4   : > { %712 = vmatpush1.bf16.msra.mxu0 %v1873_v26  ;;  %753 = vmatpush1.bf16.msra.mxu1 %v1889_v32 }
 0x1a5   : > { %713 = vmatprep.subr.bf16.mxu0 %v1876_v27  ;;  %754 = vmatprep.subr.bf16.mxu1 %v1892_v33 }
 0x1a8   : > { %714 = vmatpush1.bf16.msra.mxu0 %v1885_v30  ;;  %755 = vmatpush1.bf16.msra.mxu1 %v1896_v35 }
 0x1a9   : > { %817 = vmatprep.subr.bf16.mxu0 %v1802_v1  ;;  %858 = vmatprep.subr.bf16.mxu1 %v1817_v7  ;;  %v1150_v1 = vld [vmem:[%s1788_s21 + $0x30] sm:$0xff] }
 0x25e   : > { %v615_v43 = vpop.f32.mrb[4].mxu0  ;;  %v656_v44 = vpop.f32.mrb[4].mxu1 }
 0x25f   : > { %v663_v45 = vadd.f32 %v1148_v41, %v615_v43  ;;  %v617_v46 = vpop.f32.mrb[5].mxu0  ;;  %v658_v47 = vpop.f32.mrb[5].mxu1  ;;  %v665_v7 = vadd.f32 %v1150_v1, %v656_v44 }
 0x260   : > { %v664_v48 = vadd.f32 %v1149_v42, %v617_v46  ;;  %v619_v49 = vpop.f32.mrb[6].mxu0  ;;  %v660_v50 = vpop.f32.mrb[6].mxu1  ;;  %v666_v58 = vadd.f32 %v1151_v55, %v658_v47  ;;  %v1164_v47 = vld [vmem:[%s1788_s21 + $0x60] sm:$0xff] }
 0x261   : > { %v1152_v51 = vmul.f32 -1.442695, %v663_v45  ;;  %v620_v52 = vpop.f32.mrb[7].mxu0  ;;  %v661_v53 = vpop.f32.mrb[7].mxu1  ;;  %v1154_v56 = vmul.f32 -1.442695, %v665_v7 }
 0x262   : > { %v1153_v54 = vmul.f32 -1.442695, %v664_v48  ;;  %v1165_v48 = vld [vmem:[%s1788_s21 + $0x68] sm:$0xff] }
 0x263   : > { %1344 = vpow2.f32 %v1152_v51 }
 0x264   : > { %1346 = vpow2.f32 %v1153_v54 }
 0x265   : > { %1348 = vpow2.f32 %v1154_v56 }
 0x26d   : > { %v1345_v57 = vpop.eup %1344 }
 0x26e   : > { %v670_v59 = vadd.f32 1.0, %v1345_v57  ;;  %v1347_v60 = vpop.eup %1346 }
 0x26f   : > { %v676_v61 = vadd.f32 1.0, %v1347_v60  ;;  %v1349_v62 = vpop.eup %1348 }
 0x270   : > { %1350 = vrcp.f32 %v670_v59  ;;  %v682_v37 = vadd.f32 1.0, %v1349_v62  ;;  %v1166_v59 = vld [vmem:[%s1788_s21 + $0x70] sm:$0xff] }
 0x271   : > { %1352 = vtanh.f32 %v666_v58 }
 0x272   : > { %1354 = vrcp.f32 %v676_v61  ;;  %v1167_v61 = vld [vmem:[%s1788_s21 + $0x78] sm:$0xff] }
 0x273   : > { %1356 = vrcp.f32 %v682_v37 }
 0x27a   : > { %v1351_v63 = vpop.eup %1350 }
 0x27b   : > { %v1353_v0 = vpop.eup %1352  ;;  %v686_v31 = vmul.f32 %v1351_v63, %v1940_v36 }
 0x27c   : > { %v1355_v34 = vpop.eup %1354 }
 0x27d   : > { %v687_v38 = vmul.f32 %v1355_v34, %v1353_v0  ;;  %v1357_v40 = vpop.eup %1356 }
 0x27f   : > { %v1983_v39 = vadd.f32 %v687_v38, %v686_v31 }
 0x281   : > { %1358 = vtanh.f32 %v1983_v39 }
 0x28b   : > { %v1359_v41 = vpop.eup %1358 }
 0x28c   : > { %v690_v42 = vmul.f32 %v1359_v41, %v1357_v40 }
 0x28e   : > { %1155 = vst [vmem:[%s1799_s14 + $0x8] sm:$0xff] %v690_v42  ;;  %v698_v43 = vpack.c.bf16 %v690_v42, %v690_v42 }
 0x290   : > { %732 = vmatmul.mubr.bf16.vlgmr.msra.gmra.mrb[8].mxu0 %v698_v43  ;;  %773 = vmatmul.mubr.bf16.vlgmr.msra.gmra.mrb[8].mxu1 %v698_v43 }
 0x291   : > { %818 = vmatpush1.bf16.msra.mxu0 %v1804_v2  ;;  %859 = vmatpush1.bf16.msra.mxu1 %v1819_v8  ;;  %v1156_v2 = vld [vmem:[%s1788_s21 + $0x40] sm:$0xff] }
 0x292   : > { %819 = vmatprep.subr.bf16.mxu0 %v1809_v4  ;;  %860 = vmatprep.subr.bf16.mxu1 %v1829_v11 }
 0x293   : > { %849 = vmatprep.mubr.bf16.mxu0 %v1601_v3  ;;  %890 = vmatprep.mubr.bf16.mxu1 %v1601_v3  ;;  %v1157_v3 = vld [vmem:[%s1788_s21 + $0x48] sm:$0xff] }
 0x295   : > { %820 = vmatpush1.bf16.msra.mxu0 %v1812_v5  ;;  %861 = vmatpush1.bf16.msra.mxu1 %v1831_v12 }
 0x296   : > { %821 = vmatprep.subr.bf16.mxu0 %v1815_v6  ;;  %862 = vmatprep.subr.bf16.mxu1 %v1839_v15 }
 0x299   : > { %822 = vmatpush1.bf16.msra.mxu0 %v1822_v9  ;;  %863 = vmatpush1.bf16.msra.mxu1 %v1843_v16 }
 0x29a   : > { %823 = vmatprep.subr.bf16.mxu0 %v1826_v10  ;;  %864 = vmatprep.subr.bf16.mxu1 %v1846_v17  ;;  %v1158_v17 = vld [vmem:[%s1788_s21 + $0x50] sm:$0xff] }
 0x29d   : > { %824 = vmatpush1.bf16.msra.mxu0 %v1835_v13  ;;  %865 = vmatpush1.bf16.msra.mxu1 %v1855_v20 }
 0x29e   : > { %825 = vmatprep.subr.bf16.mxu0 %v1837_v14  ;;  %866 = vmatprep.subr.bf16.mxu1 %v1858_v21 }
 0x2a1   : > { %826 = vmatpush1.bf16.msra.mxu0 %v1849_v18  ;;  %867 = vmatpush1.bf16.msra.mxu1 %v1867_v24 }
 0x2a2   : > { %827 = vmatprep.subr.bf16.mxu0 %v1852_v19  ;;  %868 = vmatprep.subr.bf16.mxu1 %v1870_v25  ;;  %v1159_v19 = vld [vmem:[%s1788_s21 + $0x58] sm:$0xff] }
 0x2a5   : > { %828 = vmatpush1.bf16.msra.mxu0 %v1860_v22  ;;  %869 = vmatpush1.bf16.msra.mxu1 %v1879_v28 }
 0x2a6   : > { %829 = vmatprep.subr.bf16.mxu0 %v1863_v23  ;;  %870 = vmatprep.subr.bf16.mxu1 %v1882_v29 }
 0x2a9   : > { %830 = vmatpush1.bf16.msra.mxu0 %v1873_v26  ;;  %871 = vmatpush1.bf16.msra.mxu1 %v1889_v32 }
 0x2aa   : > { %831 = vmatprep.subr.bf16.mxu0 %v1876_v27  ;;  %872 = vmatprep.subr.bf16.mxu1 %v1892_v33 }
 0x2ad   : > { %832 = vmatpush1.bf16.msra.mxu0 %v1885_v30  ;;  %873 = vmatpush1.bf16.msra.mxu1 %v1896_v35 }
 0x363   : > { %v733_v4 = vpop.f32.mrb[8].mxu0  ;;  %v774_v5 = vpop.f32.mrb[8].mxu1 }
 0x364   : > { %v781_v6 = vadd.f32 %v1156_v2, %v733_v4  ;;  %v735_v8 = vpop.f32.mrb[9].mxu0  ;;  %v776_v9 = vpop.f32.mrb[9].mxu1  ;;  %v783_v18 = vadd.f32 %v1158_v17, %v774_v5 }
 0x365   : > { %v782_v10 = vadd.f32 %v1157_v3, %v735_v8  ;;  %v737_v11 = vpop.f32.mrb[10].mxu0  ;;  %v778_v12 = vpop.f32.mrb[10].mxu1  ;;  %v784_v22 = vadd.f32 %v1159_v19, %v776_v9 }
 0x366   : > { %v1160_v13 = vmul.f32 -1.442695, %v781_v6  ;;  %v738_v14 = vpop.f32.mrb[11].mxu0  ;;  %v779_v15 = vpop.f32.mrb[11].mxu1  ;;  %v1162_v20 = vmul.f32 -1.442695, %v783_v18 }
 0x367   : > { %v1161_v16 = vmul.f32 -1.442695, %v782_v10 }
 0x368   : > { %1360 = vpow2.f32 %v1160_v13 }
 0x369   : > { %1362 = vpow2.f32 %v1161_v16 }
 0x36a   : > { %1364 = vpow2.f32 %v1162_v20 }
 0x372   : > { %v1361_v21 = vpop.eup %1360 }
 0x373   : > { %v788_v23 = vadd.f32 1.0, %v1361_v21  ;;  %v1363_v24 = vpop.eup %1362 }
 0x374   : > { %v794_v25 = vadd.f32 1.0, %v1363_v24  ;;  %v1365_v26 = vpop.eup %1364 }
 0x375   : > { %1366 = vrcp.f32 %v788_v23  ;;  %v800_v32 = vadd.f32 1.0, %v1365_v26 }
 0x376   : > { %1368 = vtanh.f32 %v784_v22 }
 0x377   : > { %1370 = vrcp.f32 %v794_v25 }
 0x378   : > { %1372 = vrcp.f32 %v800_v32 }
 0x37f   : > { %v1367_v27 = vpop.eup %1366 }
 0x380   : > { %v1369_v28 = vpop.eup %1368  ;;  %v804_v29 = vmul.f32 %v1367_v27, %v1983_v39 }
 0x381   : > { %v1371_v30 = vpop.eup %1370 }
 0x382   : > { %v805_v33 = vmul.f32 %v1371_v30, %v1369_v28  ;;  %v1373_v36 = vpop.eup %1372 }
 0x384   : > { %v806_v35 = vadd.f32 %v805_v33, %v804_v29 }
 0x386   : > { %1374 = vtanh.f32 %v806_v35 }
 0x390   : > { %v1375_v44 = vpop.eup %1374 }
 0x391   : > { %v808_v45 = vmul.f32 %v1375_v44, %v1373_v36 }
 0x393   : > { %1163 = vst [vmem:[%s1799_s14 + $0x10] sm:$0xff] %v808_v45  ;;  %v816_v46 = vpack.c.bf16 %v808_v45, %v808_v45 }
 0x395   : > { %850 = vmatmul.mubr.bf16.vlgmr.msra.gmra.mrb[12].mxu0 %v816_v46  ;;  %891 = vmatmul.mubr.bf16.vlgmr.msra.gmra.mrb[12].mxu1 %v816_v46 }
 0x468   : > { %v851_v49 = vpop.f32.mrb[12].mxu0  ;;  %v892_v50 = vpop.f32.mrb[12].mxu1 }
 0x469   : > { %v899_v51 = vadd.f32 %v1164_v47, %v851_v49  ;;  %v853_v52 = vpop.f32.mrb[13].mxu0  ;;  %v894_v53 = vpop.f32.mrb[13].mxu1  ;;  %v901_v60 = vadd.f32 %v1166_v59, %v892_v50 }
 0x46a   : > { %v900_v54 = vadd.f32 %v1165_v48, %v853_v52  ;;  %v855_v1 = vpop.f32.mrb[14].mxu0  ;;  %v896_v7 = vpop.f32.mrb[14].mxu1  ;;  %v902_v0 = vadd.f32 %v1167_v61, %v894_v53 }
 0x46b   : > { %v1168_v55 = vmul.f32 -1.442695, %v899_v51  ;;  %v856_v56 = vpop.f32.mrb[15].mxu0  ;;  %v897_v57 = vpop.f32.mrb[15].mxu1  ;;  %v1170_v62 = vmul.f32 -1.442695, %v901_v60 }
 0x46c   : > { %v1169_v58 = vmul.f32 -1.442695, %v900_v54 }
 0x46d   : > { %1376 = vpow2.f32 %v1168_v55 }
 0x46e   : > { %1378 = vpow2.f32 %v1169_v58 }
 0x46f   : > { %1380 = vpow2.f32 %v1170_v62 }
 0x477   : > { %v1377_v63 = vpop.eup %1376 }
 0x478   : > { %v906_v31 = vadd.f32 1.0, %v1377_v63  ;;  %v1379_v34 = vpop.eup %1378 }
 0x479   : > { %v912_v37 = vadd.f32 1.0, %v1379_v34  ;;  %v1381_v38 = vpop.eup %1380 }
 0x47a   : > { %1382 = vrcp.f32 %v906_v31  ;;  %v918_v43 = vadd.f32 1.0, %v1381_v38 }
 0x47b   : > { %1384 = vtanh.f32 %v902_v0 }
 0x47c   : > { %1386 = vrcp.f32 %v912_v37 }
 0x47d   : > { %1388 = vrcp.f32 %v918_v43 }
 0x484   : > { %v1383_v39 = vpop.eup %1382 }
 0x485   : > { %v1385_v40 = vpop.eup %1384  ;;  %v922_v41 = vmul.f32 %v1383_v39, %v806_v35 }
 0x486   : > { %v1387_v42 = vpop.eup %1386 }
 0x487   : > { %v923_v2 = vmul.f32 %v1387_v42, %v1385_v40  ;;  %v1389_v4 = vpop.eup %1388 }
 0x489   : > { %v924_v3 = vadd.f32 %v923_v2, %v922_v41 }
 0x48b   : > { %1390 = vtanh.f32 %v924_v3  ;;  %930 = vst [vmem:[#allocation3] sm:$0xff] %v924_v3  ;;  %936 = vst [vmem:[#allocation12] sm:$0xff] (!%p1172_p6), %v924_v3 }
 0x492   : > { %934 = sbr.rel (%p1172_p6) target bundleno = 1178 (0x49a), region = 44 }
 0x495   : > { %v1391_v5 = vpop.eup %1390 }
 0x496   : > { %v926_v6 = vmul.f32 %v1391_v5, %v1389_v4 }
 0x498   : > { %1171 = vst [vmem:[%s1799_s14 + $0x18] sm:$0xff] %v926_v6  ;;  %929 = vst [vmem:[#allocation2] sm:$0xff] %v926_v6 }
 0x499   : > { %935 = vst [vmem:[#allocation10] sm:$0xff] %v926_v6 }
 0x49a PF: > { %s1602_s23 = smov [#allocation10]   ;;  %s1184_s22 = sshll.u32 %s1584_s18, 9 }
 0x49b   : > { %s968_s25 = sshll.u32 %s1602_s23, 4  ;;  %p2150_p12 = scmp.ne.s32.totalorder %s2138_s24, 0  ;;  %s969_s25 = int_to_ptr.vmem [resolvable:$true] %s968_s25 }
 0x49c   : > { %s1450_s28 = scalar_lea.vmem %s969_s25, 128  ;;  %p1457_p5 = scmp.lt.s32.totalorder %s969_s25, %s969_s25 }
 0x49d   : > { %p1451_p8 = scmp.ne.s32.totalorder %s969_s25, %s1450_s28  ;;  %p1458_p9 = scmp.lt.s32.totalorder %s1450_s28, %s1450_s28 }
 0x49f   : > { %p1452_p11 = pnand %p1451_p8, %p2150_p12  ;;  %p1459_p1 = por %p1458_p9, %p1457_p5 }
 0x4a1   : > { %p1453_p0 = pneg %p1452_p11 }
 0x4a3   : > { %p1460_p2 = pnand %p1459_p1, %p1453_p0 }
 0x4a5   : > { %1463 = shalt.err (!%p1460_p2)
}
 0x4a6   : > { %s1464_s11 = scalar_lea.hbm %s2130_s3, 128 }
 0x4a7   : > { %p1465_p3 = scmp.ne.s32.totalorder %s2130_s3, %s1464_s11  ;;  %p1470_p4 = scmp.lt.u32.totalorder %s1464_s11, %s2130_s3 }
 0x4a9   : > { %p1466_p7 = pnand %p1465_p3, %p2150_p12 }
 0x4ab   : > { %p1467_p13 = pneg %p1466_p7 }
 0x4ad   : > { %p1472_p6 = pnand %p1470_p4, %p1467_p13 }
 0x4af   : > { %1475 = shalt.err (!%p1472_p6)
}
 0x4b0   : > { %1193 = dma.vmem_to_hbm [thread:$0]  (%p2150_p12), %s969_s25, 128, %s2130_s3, [#allocation11]  }
 0x4b1   : > { %s2053_s28 = scalar_lea.hbm %s2129_s2, %s1184_s22  ;;  %s952_s6 = sshll.u32 %s1799_s14, 4  ;;  %s2056_s6 = int_to_ptr.vmem [resolvable:$true] %s952_s6 }
 0x4b2   : > { %s938_s9 = scalar_lea.sflag [#allocation6], %s1784_s12  ;;  %s1476_s11 = scalar_lea.vmem %s2056_s6, 512 }
 0x4b3   : > { %p1477_p8 = scmp.ne.s32.totalorder %s2056_s6, %s1476_s11  ;;  %s1603_s30 = smov [#allocation9]  }
 0x4b4   : > { %s1480_s7 = sshll.u32 %s1603_s30, 4  ;;  %s1481_s7 = int_to_ptr.vmem [resolvable:$false] %s1480_s7 }
 0x4b5   : > { %p1478_p11 = pnand %p1477_p8, %p1728_p10  ;;  %s1482_s25 = scalar_lea.vmem %s1481_s7, 1024 }
 0x4b6   : > { %p1483_p5 = scmp.lt.s32.totalorder %s2056_s6, %s1481_s7  ;;  %p1484_p9 = scmp.lt.s32.totalorder %s1482_s25, %s1476_s11 }
 0x4b7   : > { %p1479_p0 = pneg %p1478_p11 }
 0x4b8   : > { %p1485_p1 = por %p1484_p9, %p1483_p5 }
 0x4ba   : > { %p1486_p2 = pnand %p1485_p1, %p1479_p0 }
 0x4bc   : > { %1489 = shalt.err (!%p1486_p2)
}
 0x4bd   : > { %s1490_s14 = scalar_lea.hbm %s2053_s28, 512  ;;  %s1494_s13 = scalar_lea.hbm %s2129_s2, 1024 }
 0x4be   : > { %p1491_p3 = scmp.ne.s32.totalorder %s2053_s28, %s1490_s14  ;;  %p1495_p4 = scmp.lt.u32.totalorder %s2053_s28, %s2129_s2 }
 0x4bf   : > { %p1496_p6 = scmp.lt.u32.totalorder %s1494_s13, %s1490_s14  ;;  %p1498_p11 = scmp.lt.u32.totalorder %s1490_s14, %s2053_s28 }
 0x4c0   : > { %p1492_p7 = pnand %p1491_p3, %p1728_p10 }
 0x4c1   : > { %p1497_p8 = por %p1496_p6, %p1495_p4 }
 0x4c2   : > { %p1493_p13 = pneg %p1492_p7 }
 0x4c3   : > { %p1499_p0 = por %p1498_p11, %p1497_p8 }
 0x4c5   : > { %p1500_p5 = pnand %p1499_p0, %p1493_p13 }
 0x4c7   : > { %1503 = shalt.err (!%p1500_p5)
}
 0x4c8   : > { %s1604_s27 = smov 128   ;;  %s1605_s23 = smov 8  }
 0x4c9   : > { %1191 = dma.vmem_to_hbm [thread:$0]  (%p1728_p10), %s2056_s6, 512, %s2053_s28, %s938_s9, %s1604_s27, %s1604_s27, %s1605_s23  }
 0x4ca   : > { %s1606_s11 = smov [#allocation12]  }
 0x4cb   : > { %s981_s30 = sshll.u32 %s1606_s11, 4  ;;  %s982_s30 = int_to_ptr.vmem [resolvable:$true] %s981_s30 }
 0x4cc   : > { %s1504_s7 = scalar_lea.vmem %s982_s30, 128  ;;  %p1511_p3 = scmp.lt.s32.totalorder %s982_s30, %s982_s30 }
 0x4cd   : > { %p1505_p9 = scmp.ne.s32.totalorder %s982_s30, %s1504_s7  ;;  %p1512_p7 = scmp.lt.s32.totalorder %s1504_s7, %s1504_s7 }
 0x4cf   : > { %p1506_p1 = pnand %p1505_p9, %p2150_p12  ;;  %p1513_p13 = por %p1512_p7, %p1511_p3 }
 0x4d1   : > { %p1507_p2 = pneg %p1506_p1 }
 0x4d3   : > { %p1514_p4 = pnand %p1513_p13, %p1507_p2 }
 0x4d5   : > { %1517 = shalt.err (!%p1514_p4)
}
 0x4d6   : > { %s1518_s8 = scalar_lea.hbm %s2131_s4, 128 }
 0x4d7   : > { %p1519_p10 = scmp.ne.s32.totalorder %s2131_s4, %s1518_s8  ;;  %p1524_p11 = scmp.lt.u32.totalorder %s1518_s8, %s2131_s4 }
 0x4d9   : > { %p1520_p6 = pnand %p1519_p10, %p2150_p12 }
 0x4db   : > { %p1521_p8 = pneg %p1520_p6 }
 0x4dd   : > { %p1526_p0 = pnand %p1524_p11, %p1521_p8 }
 0x4df   : > { %1529 = shalt.err (!%p1526_p0)
}
 0x4e0   : > { %1195 = dma.vmem_to_hbm [thread:$0]  (%p2150_p12), %s982_s30, 128, %s2131_s4, [#allocation11]  }
 0x4e1   : > { %1563 = dma.done.wait (%p2150_p12), [#allocation11], 256  }
 0x4e2   : > { %1565 = vsyncadd (%p2150_p12), [#allocation11], 4294967040 }
 0x4e3 PF: > { %s1001_s13 = sand.u32 1, %s1572_s15   ;;  %p2151_p5 = scmp.ne.s32.totalorder %s2140_s26, 0 }
 0x4e4   : > { %p2152_p9 = scmp.ge.s32.totalorder %s1592_s20, 2  ;;  %s1002_s29 = scalar_lea.sflag [#allocation6], %s1001_s13 }
 0x4e6   : > { %p1210_p1 = pnand %p2152_p9, %p2151_p5 }
 0x4e8   : > { %1567 = dma.done.wait (!%p1210_p1), %s1002_s29, 512  }
 0x4e9   : > { %1569 = vsyncadd (!%p1210_p1), %s1002_s29, 4294966784  ;;  %s23_s20 = sadd.s32 1, %s1592_s20   ;;  %s2153_s15 = smov %s1576_s16 }
 0x4ea   : > { %p20_p2 = scmp.ge.s32.totalorder %s23_s20, 4   ;;  %s2154_s16 = smov %s1580_s17 }
 0x4eb   : > { %s2155_s17 = smov %s1737_s10  ;;  %s2156_s18 = smov %s1588_s19 }
 0x4ec   : > { %s2157_s19 = smov %s2159_s5  ;;  %22 = sbr.rel (!%p20_p2) target bundleno = 8 (0x8), region = 109 }
 0x4f3   :  { %1007 = vsyncpa [#allocation5], 1 }
 0x4f4   :  { %1009 = vsyncpa [#allocation5 + $0x1], 1 }
 0x4f5   :  { %1010 = vsyncpa [#allocation8], 1 }
 0x4f6   :  { %1011 = vsyncpa [#allocation6], 1 }
 0x4f7   :  { %1013 = vsyncpa [#allocation6 + $0x1], 1 }
 0x4f8   :  { %1014 = vsyncpa [#allocation11], 1 }

</bundles_post_ra>
